<compile_context>
chip_gen: v6e
topology: v6e:2x2x1
jax: 0.10.0
libtpu: 0.0.40
codegen_flags: <defaults>
</compile_context>

<pallas_src>
import jax
import jax.numpy as jnp
from jax.experimental import pallas as pl
from jax.experimental.pallas import tpu as pltpu

BN_EPS = 1e-5


def _round_up(x, m):
    return ((x + m - 1) // m) * m


# ----------------- Phase 1: tiled matmul + one-pass BN statistics ------------
def _stats_kernel(x_ref, w_ref, sum_ref, sumsq_ref):
    # x_ref: (TM, Cin_pad), w_ref: (Cin_pad, Cout_pad)
    # sum_ref / sumsq_ref: (1, Cout_pad), resident across the M grid axis.
    @pl.when(pl.program_id(0) == 0)
    def _():
        sum_ref[...] = jnp.zeros_like(sum_ref)
        sumsq_ref[...] = jnp.zeros_like(sumsq_ref)

    y = jnp.dot(x_ref[...], w_ref[...], preferred_element_type=jnp.float32)
    sum_ref[...] += jnp.sum(y, axis=0, keepdims=True)
    sumsq_ref[...] += jnp.sum(y * y, axis=0, keepdims=True)


# ----------------- Phase 2: tiled matmul + fused BN affine + ReLU ------------
def _apply_kernel(x_ref, w_ref, scale_ref, shift_ref, o_ref):
    # scale/shift: (1, Cout_pad) f32 precomputed from batch stats + gamma/beta.
    y = jnp.dot(x_ref[...], w_ref[...], preferred_element_type=jnp.float32)
    o_ref[...] = jnp.maximum(y * scale_ref[...] + shift_ref[...], 0.0).astype(o_ref.dtype)


def projection_shortcut_nhwc(x_nhwc, conv_w, conv_b, bn_gamma, bn_beta,
                             stride=(1, 1), *, tile_m=512):
    """1x1 Conv2d(stride) + BatchNorm2d (batch stats) + ReLU.  NHWC in/out."""
    del conv_b  # cancelled exactly by the training-mode BN mean subtraction.
    N, H, W, Cin = x_nhwc.shape
    Cout = conv_w.shape[0]
    sh, sw = stride

    # Strided 1x1 conv == spatial subsample + channel matmul.
    # TODO(synk): fold the spatial stride into a BlockSpec index_map over H/W
    # grid axes so the strided copy is never materialized.
    x_s = x_nhwc[:, ::sh, ::sw, :]
    Ho, Wo = x_s.shape[1], x_s.shape[2]
    M = N * Ho * Wo
    dtype = x_nhwc.dtype
    itemsize = jnp.dtype(dtype).itemsize

    # Padding for lane/sublane density and tiling legality.
    cout_pad = _round_up(Cout, 128)   # lane-dense output / MXU columns
    cin_pad = _round_up(Cin, 8)       # f32 sublanes for w
    tm = min(tile_m, _round_up(M, 8))
    m_pad = _round_up(M, tm)
    n_tiles = m_pad // tm

    x_mat = x_s.reshape(M, Cin)
    x_mat = jnp.pad(x_mat, ((0, m_pad - M), (0, cin_pad - Cin)))
    w_mat = jnp.transpose(conv_w.reshape(Cout, Cin), (1, 0)).astype(dtype)
    w_mat = jnp.pad(w_mat, ((0, cin_pad - Cin), (0, cout_pad - Cout)))

    x_spec = pl.BlockSpec((tm, cin_pad), lambda i: (i, 0))
    w_spec = pl.BlockSpec((cin_pad, cout_pad), lambda i: (0, 0))
    row_spec = pl.BlockSpec((1, cout_pad), lambda i: (0, 0))

    # VMEM budget: double-buffered input tiles + resident w + f32 y tile +
    # output tile + headroom.  Clamped so it is valid on v5e/v6e/v7x.
    x_tile_b = tm * cin_pad * itemsize
    w_b = cin_pad * cout_pad * itemsize
    y_tile_b = tm * cout_pad * 4
    o_tile_b = tm * cout_pad * itemsize
    vmem_est = 2 * (x_tile_b + w_b) + 2 * (y_tile_b + o_tile_b) + (8 << 20)
    vmem_limit = int(min(max(vmem_est, 16 << 20), 64 << 20))

    flops = 2 * m_pad * cin_pad * cout_pad

    # ---- Phase 1: per-channel sum / sum-of-squares over all M rows ----------
    stats_params = pltpu.CompilerParams(
        dimension_semantics=("arbitrary",),  # accumulator lives across M axis
        vmem_limit_bytes=vmem_limit,
    )
    ch_sum, ch_sumsq = pl.pallas_call(
        _stats_kernel,
        grid=(n_tiles,),
        in_specs=[x_spec, w_spec],
        out_specs=(row_spec, row_spec),
        out_shape=(
            jax.ShapeDtypeStruct((1, cout_pad), jnp.float32),
            jax.ShapeDtypeStruct((1, cout_pad), jnp.float32),
        ),
        compiler_params=stats_params,
        cost_estimate=pl.CostEstimate(
            flops=flops,
            transcendentals=0,
            bytes_accessed=m_pad * cin_pad * itemsize + w_b + 2 * cout_pad * 4,
        ),
    )(x_mat, w_mat)

    # Tiny per-channel finalize (one-pass stats; zero-padded rows contribute 0).
    mean = ch_sum[0] / M
    var = jnp.maximum(ch_sumsq[0] / M - mean * mean, 0.0)
    rstd = 1.0 / jnp.sqrt(var + BN_EPS)
    gamma = jnp.pad(bn_gamma.astype(jnp.float32), (0, cout_pad - Cout))
    beta = jnp.pad(bn_beta.astype(jnp.float32), (0, cout_pad - Cout))
    scale = (gamma * rstd).reshape(1, cout_pad)
    shift = (beta - mean * gamma * rstd).reshape(1, cout_pad)

    # ---- Phase 2: recompute matmul + fused BN affine + ReLU ------------------
    apply_params = pltpu.CompilerParams(
        dimension_semantics=("parallel",),
        vmem_limit_bytes=vmem_limit,
    )
    out = pl.pallas_call(
        _apply_kernel,
        grid=(n_tiles,),
        in_specs=[x_spec, w_spec, row_spec, row_spec],
        out_specs=pl.BlockSpec((tm, cout_pad), lambda i: (i, 0)),
        out_shape=jax.ShapeDtypeStruct((m_pad, cout_pad), dtype),
        compiler_params=apply_params,
        cost_estimate=pl.CostEstimate(
            flops=flops,
            transcendentals=0,
            bytes_accessed=m_pad * (cin_pad + cout_pad) * itemsize + w_b,
        ),
    )(x_mat, w_mat, scale, shift)

    return out[:M, :Cout].reshape(N, Ho, Wo, Cout)


def projection_shortcut(x_nchw, conv_w, conv_b, bn_gamma, bn_beta, stride=(1, 1)):
    """PyTorch-layout (NCHW) adapter.  Prefer projection_shortcut_nhwc to avoid
    the layout transposes entirely when the surrounding model is NHWC."""
    x_nhwc = jnp.transpose(x_nchw, (0, 2, 3, 1))
    out = projection_shortcut_nhwc(x_nhwc, conv_w, conv_b, bn_gamma, bn_beta, stride)
    return jnp.transpose(out, (0, 3, 1, 2))


def _reference(x_nchw, conv_w, conv_b, bn_gamma, bn_beta, stride=(1, 1)):
    sh, sw = stride
    x_s = x_nchw[:, :, ::sh, ::sw]
    y = jnp.einsum("nchw,oc->nohw", x_s, conv_w.reshape(conv_w.shape[0], -1))
    y = y + conv_b[None, :, None, None]
    mean = jnp.mean(y, axis=(0, 2, 3), keepdims=True)
    var = jnp.mean((y - mean) ** 2, axis=(0, 2, 3), keepdims=True)
    y = (y - mean) / jnp.sqrt(var + BN_EPS)
    y = y * bn_gamma[None, :, None, None] + bn_beta[None, :, None, None]
    return jnp.maximum(y, 0.0)


if __name__ == "__main__":
    key = jax.random.PRNGKey(0)
    k_x, k_w, k_b, k_g, k_be = jax.random.split(key, 5)

    # ProjectionShortcut(actual=4, projection=8, stride=(2, 2))
    N, Cin, H, W = 2, 4, 16, 16
    Cout = 8
    stride = (2, 2)

    x = jax.random.normal(k_x, (N, Cin, H, W), dtype=jnp.float32)
    conv_w = jax.random.normal(k_w, (Cout, Cin, 1, 1), dtype=jnp.float32) * 0.1
    conv_b = jax.random.normal(k_b, (Cout,), dtype=jnp.float32) * 0.1
    bn_gamma = 1.0 + 0.1 * jax.random.normal(k_g, (Cout,), dtype=jnp.float32)
    bn_beta = 0.1 * jax.random.normal(k_be, (Cout,), dtype=jnp.float32)

    out = projection_shortcut(x, conv_w, conv_b, bn_gamma, bn_beta, stride=stride)
    out = jax.block_until_ready(out)

    ref = _reference(x, conv_w, conv_b, bn_gamma, bn_beta, stride=stride)
    assert out.shape == (N, Cout, H // stride[0], W // stride[1]), out.shape
    assert jnp.allclose(out, ref, atol=1e-4, rtol=1e-4), float(jnp.max(jnp.abs(out - ref)))

    print("KERNEL_OK")
</pallas_src>

<mosaic_0001>
module attributes {stable_mosaic.version = 11 : i64} {
  func.func @_stats_kernel(%arg0: i32, %arg1: memref<128x8xf32, #tpu.memory_space<vmem>>, %arg2: memref<8x128xf32, #tpu.memory_space<vmem>>, %arg3: memref<1x128xf32, #tpu.memory_space<vmem>>, %arg4: memref<1x128xf32, #tpu.memory_space<vmem>>) attributes {dimension_semantics = [#tpu.dimension_semantics<arbitrary>], iteration_bounds = array<i64: 1>, scalar_prefetch = 0 : i64, scratch_operands = 0 : i64, tpu.core_type = #tpu.core_type<tc>, window_params = [{transform_indices = @transform_0, window_bounds = array<i64: 128, 8>}, {pipeline_mode = #tpu.pipeline_mode<synchronous>, transform_indices = @transform_1, window_bounds = array<i64: 8, 128>}, {pipeline_mode = #tpu.pipeline_mode<synchronous>, transform_indices = @transform_2, window_bounds = array<i64: 1, 128>}, {pipeline_mode = #tpu.pipeline_mode<synchronous>, transform_indices = @transform_3, window_bounds = array<i64: 1, 128>}]} {
    %c0_i32 = arith.constant 0 : i32
    %0 = arith.cmpi eq, %arg0, %c0_i32 : i32
    %1 = arith.extui %0 : i1 to i32
    %c0_i32_0 = arith.constant 0 : i32
    %2 = arith.cmpi ne, %1, %c0_i32_0 : i32
    scf.if %2 {
      %cst_14 = arith.constant 0.000000e+00 : f32
      %17 = vector.broadcast %cst_14 : f32 to vector<1x128xf32>
      %c0_15 = arith.constant 0 : index
      %c0_16 = arith.constant 0 : index
      %18 = vector.load %arg3[%c0_15, %c0_16] : memref<1x128xf32, #tpu.memory_space<vmem>>, vector<1x128xf32>
      tpu.vector_store %arg3[%c0_15, %c0_16], %17 {strides = array<i32>} : memref<1x128xf32, #tpu.memory_space<vmem>>, vector<1x128xf32>,
      %cst_17 = arith.constant 0.000000e+00 : f32
      %19 = vector.broadcast %cst_17 : f32 to vector<1x128xf32>
      %c0_18 = arith.constant 0 : index
      %c0_19 = arith.constant 0 : index
      %20 = vector.load %arg4[%c0_18, %c0_19] : memref<1x128xf32, #tpu.memory_space<vmem>>, vector<1x128xf32>
      tpu.vector_store %arg4[%c0_18, %c0_19], %19 {strides = array<i32>} : memref<1x128xf32, #tpu.memory_space<vmem>>, vector<1x128xf32>,
    } else {
    }
    %c0 = arith.constant 0 : index
    %c0_1 = arith.constant 0 : index
    %3 = vector.load %arg1[%c0, %c0_1] : memref<128x8xf32, #tpu.memory_space<vmem>>, vector<128x8xf32>
    %c0_2 = arith.constant 0 : index
    %c0_3 = arith.constant 0 : index
    %4 = vector.load %arg2[%c0_2, %c0_3] : memref<8x128xf32, #tpu.memory_space<vmem>>, vector<8x128xf32>
    %cst = arith.constant dense<0.000000e+00> : vector<128x128xf32>
    %5 = tpu.matmul %3, %4, %cst {dimension_numbers = #tpu.dot_dimension_numbers<[1], [0], [0], [1], [0, 0, 1, 1], [], []>} : vector<128x8xf32>, vector<8x128xf32>, vector<128x128xf32> -> vector<128x128xf32>
    %c0_4 = arith.constant 0 : index
    %c0_5 = arith.constant 0 : index
    %6 = vector.load %arg3[%c0_4, %c0_5] : memref<1x128xf32, #tpu.memory_space<vmem>>, vector<1x128xf32>
    %cst_6 = arith.constant dense<0.000000e+00> : vector<128xf32>
    %7 = vector.multi_reduction <add>, %5, %cst_6 [0] : vector<128x128xf32> to vector<128xf32>
    %8 = vector.shape_cast %7 : vector<128xf32> to vector<1x128xf32>
    %9 = arith.addf %6, %8 : vector<1x128xf32>
    %c0_7 = arith.constant 0 : index
    %c0_8 = arith.constant 0 : index
    %10 = vector.load %arg3[%c0_7, %c0_8] : memref<1x128xf32, #tpu.memory_space<vmem>>, vector<1x128xf32>
    tpu.vector_store %arg3[%c0_7, %c0_8], %9 {strides = array<i32>} : memref<1x128xf32, #tpu.memory_space<vmem>>, vector<1x128xf32>,
    %c0_9 = arith.constant 0 : index
    %c0_10 = arith.constant 0 : index
    %11 = vector.load %arg4[%c0_9, %c0_10] : memref<1x128xf32, #tpu.memory_space<vmem>>, vector<1x128xf32>
    %12 = arith.mulf %5, %5 : vector<128x128xf32>
    %cst_11 = arith.constant dense<0.000000e+00> : vector<128xf32>
    %13 = vector.multi_reduction <add>, %12, %cst_11 [0] : vector<128x128xf32> to vector<128xf32>
    %14 = vector.shape_cast %13 : vector<128xf32> to vector<1x128xf32>
    %15 = arith.addf %11, %14 : vector<1x128xf32>
    %c0_12 = arith.constant 0 : index
    %c0_13 = arith.constant 0 : index
    %16 = vector.load %arg4[%c0_12, %c0_13] : memref<1x128xf32, #tpu.memory_space<vmem>>, vector<1x128xf32>
    tpu.vector_store %arg4[%c0_12, %c0_13], %15 {strides = array<i32>} : memref<1x128xf32, #tpu.memory_space<vmem>>, vector<1x128xf32>,
    return
  }
  func.func @transform_0(%arg0: i32) -> (i32, i32) {
    %c0_i32 = arith.constant 0 : i32
    %c0_i32_0 = arith.constant 0 : i32
    return %arg0, %c0_i32 : i32, i32
  }
  func.func @transform_1(%arg0: i32) -> (i32, i32) {
    %c0_i32 = arith.constant 0 : i32
    %c0_i32_0 = arith.constant 0 : i32
    %c0_i32_1 = arith.constant 0 : i32
    return %c0_i32, %c0_i32_0 : i32, i32
  }
  func.func @transform_2(%arg0: i32) -> (i32, i32) {
    %c0_i32 = arith.constant 0 : i32
    %c0_i32_0 = arith.constant 0 : i32
    %c0_i32_1 = arith.constant 0 : i32
    return %c0_i32, %c0_i32_0 : i32, i32
  }
  func.func @transform_3(%arg0: i32) -> (i32, i32) {
    %c0_i32 = arith.constant 0 : i32
    %c0_i32_0 = arith.constant 0 : i32
    %c0_i32_1 = arith.constant 0 : i32
    return %c0_i32, %c0_i32_0 : i32, i32
  }
}

</mosaic_0001>

<bundles_post_ra>
// kernel: tpu_custom_call.1
= control target key start
LH: loop header
LB: loop body
LE: loop exit
PB: predicated region body
PF: predicated region fallthrough
CT: control target
= control target key end

     0   :  { %9 = vsyncpa [#allocation3], 0  ;;  %vm38_vm0 = vcmask 64512   ;;  %s528_s0 = inlined_call_operand.vmem [shape: f32[128,8], index: 0, kind: input, shape index: {}]   ;;  %s529_s1 = inlined_call_operand.vmem [shape: f32[8,128], index: 1, kind: input, shape index: {}]   ;;  %s530_s2 = inlined_call_operand.hbm [shape: f32[1,128], index: 2, kind: output, shape index: {0}]   ;;  %s531_s3 = inlined_call_operand.hbm [shape: f32[1,128], index: 3, kind: output, shape index: {1}]  }
   0x1   :  { %v37_v0 = vld [vmem:[%s529_s1] sm:$0xff]  ;;  %v22_v2 = vld [vmem:[%s528_s0 + $0x8] sm:$0xff]  ;;  %v23_v3 = vld [vmem:[%s528_s0 + $0x10] sm:$0xff] }
   0x2   :  { %v21_v1 = vld [vmem:[%s528_s0] sm:$0xff]  ;;  %357 = vmatprep.subr.mxu0 %v37_v0  ;;  %383 = vmatprep.subr.mxu1 %v37_v0  ;;  %v30_v5 = vld [vmem:[%s528_s0 + $0x48] sm:$0xff]  ;;  %v31_v6 = vld [vmem:[%s528_s0 + $0x50] sm:$0xff] }
   0x3   :  { %359 = vmatprep.mubr.msk.f32.mxu0 %vm38_vm0, %v21_v1  ;;  %358 = vmatpush3.msra.mxu0 %v37_v0  ;;  %v29_v4 = vld [vmem:[%s528_s0 + $0x40] sm:$0xff]  ;;  %v24_v7 = vld [vmem:[%s528_s0 + $0x18] sm:$0xff] }
   0x4   :  { %360 = vmatmul.mubr.msk.f32.vlgmr.msra.gmra.mxu0 %vm38_vm0, %v22_v2  ;;  %384 = vmatpush3.msra.mxu1 %v37_v0  ;;  %v25_v8 = vld [vmem:[%s528_s0 + $0x20] sm:$0xff] }
   0x5   :  { %362 = vmatprep.mubr.msk.f32.mxu0 %vm38_vm0, %v23_v3  ;;  %371 = vmatprep.mubr.msk.f32.mxu1 %vm38_vm0, %v29_v4 }
   0x6   :  { %372 = vmatmul.mubr.msk.f32.vlgmr.msra.gmra.mxu1 %vm38_vm0, %v30_v5 }
   0x7   :  { %10 = vsyncpa [#allocation5], 0  ;;  %374 = vmatprep.mubr.msk.f32.mxu1 %vm38_vm0, %v31_v6  ;;  %v32_v9 = vld [vmem:[%s528_s0 + $0x58] sm:$0xff]  ;;  %v33_v10 = vld [vmem:[%s528_s0 + $0x60] sm:$0xff]  ;;  %v432_v17 = vmov 0.0   ;;  %s434_s19 = smov [#allocation4]  }
   0x8   :  { %363 = vmatmul.mubr.msk.f32.gmra.mxu0 %vm38_vm0, %v24_v7  ;;  %v26_v11 = vld [vmem:[%s528_s0 + $0x28] sm:$0xff]  ;;  %v27_v12 = vld [vmem:[%s528_s0 + $0x30] sm:$0xff]  ;;  %v28_v15 = vld [vmem:[%s528_s0 + $0x38] sm:$0xff]  ;;  %19 = vst [vmem:[#allocation2] sm:$0x1] %v432_v17  ;;  %s312_s1 = sshll.u32 %s434_s19, 4  ;;  %s313_s1 = int_to_ptr.vmem [resolvable:$true] %s312_s1 }
   0x9   :  { %365 = vmatprep.mubr.msk.f32.mxu0 %vm38_vm0, %v25_v8  ;;  %v34_v13 = vld [vmem:[%s528_s0 + $0x68] sm:$0xff]  ;;  %v35_v14 = vld [vmem:[%s528_s0 + $0x70] sm:$0xff]  ;;  %v36_v16 = vld [vmem:[%s528_s0 + $0x78] sm:$0xff]  ;;  %20 = vst [vmem:[#allocation4] sm:$0x1] %v432_v17  ;;  %s433_s0 = smov [#allocation2]  }
   0xa   :  { %375 = vmatmul.mubr.msk.f32.gmra.mxu1 %vm38_vm0, %v32_v9  ;;  %s302_s18 = sshll.u32 %s433_s0, 4  ;;  %s303_s18 = int_to_ptr.vmem [resolvable:$true] %s302_s18 }
   0xb   :  { %377 = vmatprep.mubr.msk.f32.mxu1 %vm38_vm0, %v33_v10  ;;  %s388_s20 = scalar_lea.vmem %s303_s18, 16  ;;  %s392_s21 = scalar_lea.vmem %s303_s18, 32 }
   0xc   :  { %366 = vmatmul.mubr.msk.f32.gmra.mxu0 %vm38_vm0, %v26_v11  ;;  %p389_p0 = scmp.ne.s32.totalorder %s303_s18, %s388_s20  ;;  %p393_p1 = scmp.lt.s32.totalorder %s303_s18, %s303_s18 }
   0xd   :  { %368 = vmatprep.mubr.msk.f32.mxu0 %vm38_vm0, %v27_v12  ;;  %p394_p2 = scmp.lt.s32.totalorder %s392_s21, %s388_s20 }
   0xe   :  { %378 = vmatmul.mubr.msk.f32.gmra.mxu1 %vm38_vm0, %v34_v13 }
   0xf   :  { %380 = vmatprep.mubr.msk.f32.mxu1 %vm38_vm0, %v35_v14  ;;  %p395_p3 = por %p394_p2, %p393_p1 }
  0x10   :  { %369 = vmatmul.mubr.msk.f32.gmra.mxu0 %vm38_vm0, %v28_v15 }
  0x11   :  { %p396_p4 = pnand %p395_p3, %p389_p0 }
  0x12   :  { %381 = vmatmul.mubr.msk.f32.gmra.mxu1 %vm38_vm0, %v36_v16 }
  0xc4   :  { %v361_v18 = vpop.f32.mrf.mxu0 }
  0xc5   :  { %v258_v24 = vmul.f32 %v361_v18, %v361_v18 }
  0xc6   :  { %v153_v19 = vpop.f32.mrf.mxu0  ;;  %v373_v20 = vpop.f32.mrf.mxu1 }
  0xc7   :  { %v257_v21 = vmul.f32 %v153_v19, %v153_v19  ;;  %v233_v25 = vadd.f32 %v361_v18, %v153_v19  ;;  %v266_v56 = vmul.f32 %v373_v20, %v373_v20 }
  0xc8   :  { %v364_v22 = vpop.f32.mrf.mxu0  ;;  %v193_v23 = vpop.f32.mrf.mxu1 }
  0xc9   :  { %v273_v27 = vadd.f32 %v258_v24, %v257_v21  ;;  %v260_v32 = vmul.f32 %v364_v22, %v364_v22  ;;  %v265_v54 = vmul.f32 %v193_v23, %v193_v23 }
  0xca   :  { %v163_v26 = vpop.f32.mrf.mxu0  ;;  %v376_v31 = vpop.f32.mrf.mxu1 }
  0xcb   :  { %v234_v28 = vadd.f32 %v233_v25, %v163_v26  ;;  %v259_v29 = vmul.f32 %v163_v26, %v163_v26  ;;  %v268_v63 = vmul.f32 %v376_v31, %v376_v31  ;;  %v232_v25 = vld [vmem:[#allocation2] sm:$0x1] }
  0xcc   :  { %v367_v30 = vpop.f32.mrf.mxu0  ;;  %v203_v40 = vpop.f32.mrf.mxu1 }
  0xcd   :  { %v274_v33 = vadd.f32 %v273_v27, %v259_v29  ;;  %v235_v34 = vadd.f32 %v364_v22, %v234_v28  ;;  %v262_v41 = vmul.f32 %v367_v30, %v367_v30  ;;  %v267_v60 = vmul.f32 %v203_v40, %v203_v40  ;;  %v256_v28 = vld [vmem:[#allocation4] sm:$0x1] }
  0xce   :  { %v173_v35 = vpop.f32.mrf.mxu0  ;;  %v379_v48 = vpop.f32.mrf.mxu1 }
  0xcf   :  { %v236_v36 = vadd.f32 %v235_v34, %v173_v35  ;;  %v261_v37 = vmul.f32 %v173_v35, %v173_v35  ;;  %v275_v38 = vadd.f32 %v274_v33, %v260_v32  ;;  %v270_v6 = vmul.f32 %v379_v48, %v379_v48 }
  0xd0   :  { %v370_v39 = vpop.f32.mrf.mxu0  ;;  %v213_v55 = vpop.f32.mrf.mxu1 }
  0xd1   :  { %v276_v42 = vadd.f32 %v275_v38, %v261_v37  ;;  %v237_v43 = vadd.f32 %v367_v30, %v236_v36  ;;  %v264_v49 = vmul.f32 %v370_v39, %v370_v39  ;;  %v269_v3 = vmul.f32 %v213_v55, %v213_v55 }
  0xd2   :  { %v183_v44 = vpop.f32.mrf.mxu0  ;;  %v382_v62 = vpop.f32.mrf.mxu1 }
  0xd3   :  { %v238_v45 = vadd.f32 %v237_v43, %v183_v44  ;;  %v263_v46 = vmul.f32 %v183_v44, %v183_v44  ;;  %v277_v47 = vadd.f32 %v276_v42, %v262_v41  ;;  %v272_v12 = vmul.f32 %v382_v62, %v382_v62 }
  0xd4   :  { %v223_v5 = vpop.f32.mrf.mxu1 }
  0xd5   :  { %v239_v50 = vadd.f32 %v370_v39, %v238_v45  ;;  %v278_v51 = vadd.f32 %v277_v47, %v263_v46  ;;  %v271_v10 = vmul.f32 %v223_v5, %v223_v5 }
  0xd7   :  { %v279_v52 = vadd.f32 %v278_v51, %v264_v49  ;;  %v240_v53 = vadd.f32 %v239_v50, %v193_v23 }
  0xd9   :  { %v280_v57 = vadd.f32 %v279_v52, %v265_v54  ;;  %v241_v58 = vadd.f32 %v373_v20, %v240_v53 }
  0xdb   :  { %v242_v59 = vadd.f32 %v241_v58, %v203_v40  ;;  %v281_v61 = vadd.f32 %v280_v57, %v266_v56 }
  0xdd   :  { %v282_v0 = vadd.f32 %v281_v61, %v267_v60  ;;  %v243_v1 = vadd.f32 %v376_v31, %v242_v59 }
  0xdf   :  { %v244_v2 = vadd.f32 %v243_v1, %v213_v55  ;;  %v283_v4 = vadd.f32 %v282_v0, %v268_v63 }
  0xe1   :  { %v284_v7 = vadd.f32 %v283_v4, %v269_v3  ;;  %v245_v8 = vadd.f32 %v379_v48, %v244_v2 }
  0xe3   :  { %v246_v9 = vadd.f32 %v245_v8, %v223_v5  ;;  %v285_v11 = vadd.f32 %v284_v7, %v270_v6 }
  0xe5   :  { %v247_v13 = vadd.f32 %v382_v62, %v246_v9  ;;  %v286_v14 = vadd.f32 %v285_v11, %v271_v10 }
  0xe7   :  { %v248_v15 = vrot.slane %v247_v13, 4  ;;  %v287_v16 = vadd.f32 %v286_v14, %v272_v12 }
  0xe9   :  { %v249_v17 = vadd.f32 %v248_v15, %v247_v13  ;;  %v288_v18 = vrot.slane %v287_v16, 4 }
  0xeb   :  { %v250_v19 = vrot.slane %v249_v17, 2  ;;  %v289_v20 = vadd.f32 %v288_v18, %v287_v16 }
  0xed   :  { %v251_v21 = vadd.f32 %v250_v19, %v249_v17  ;;  %v290_v22 = vrot.slane %v289_v20, 2 }
  0xef   :  { %v291_v23 = vadd.f32 %v290_v22, %v289_v20  ;;  %v252_v24 = vrot.slane %v251_v21, 1 }
  0xf1   :  { %v253_v26 = vadd.f32 %v252_v24, %v251_v21  ;;  %v292_v27 = vrot.slane %v291_v23, 1 }
  0xf3   :  { %v254_v29 = vadd.f32 %v253_v26, %v232_v25  ;;  %v293_v30 = vadd.f32 %v292_v27, %v291_v23 }
  0xf5   :  { %255 = vst [vmem:[#allocation2] sm:$0x1] %v254_v29  ;;  %v294_v31 = vadd.f32 %v293_v30, %v256_v28 }
  0xf6   :  { %399 = shalt.err (!%p396_p4)
}
  0xf7   :  { %305 = dma.vmem_to_hbm [thread:$0]  %s303_s18, 16, %s530_s2, [#allocation3]   ;;  %295 = vst [vmem:[#allocation4] sm:$0x1] %v294_v31 }
  0xf8   :  { %s408_s24 = scalar_lea.vmem %s313_s1, 16  ;;  %s412_s25 = scalar_lea.vmem %s313_s1, 32 }
  0xf9   :  { %p409_p5 = scmp.ne.s32.totalorder %s313_s1, %s408_s24  ;;  %p413_p6 = scmp.lt.s32.totalorder %s313_s1, %s313_s1 }
  0xfa   :  { %p414_p7 = scmp.lt.s32.totalorder %s412_s25, %s408_s24 }
  0xfc   :  { %p415_p8 = por %p414_p7, %p413_p6 }
  0xfe   :  { %p416_p9 = pnand %p415_p8, %p409_p5 }
 0x100   :  { %419 = shalt.err (!%p416_p9)
}
 0x101   :  { %315 = dma.vmem_to_hbm [thread:$0]  %s313_s1, 16, %s531_s3, [#allocation5]  }
 0x102   :  { %428 = dma.done.wait [#allocation3], 16  }
 0x103   :  { %429 = vsyncadd [#allocation3], 4294967280 }
 0x104   :  { %430 = dma.done.wait [#allocation5], 16  }
 0x105   :  { %431 = vsyncadd [#allocation5], 4294967280 }
 0x106   :  { %322 = vsyncpa [#allocation3], 1 }
 0x107   :  { %323 = vsyncpa [#allocation5], 1 }

</bundles_post_ra>
